<compile_context>
chip_gen: v7x
topology: tpu7x:2x2x1
jax: 0.10.0
libtpu: 0.0.40
codegen_flags: <defaults>
</compile_context>

<pallas_src>
import functools

import jax
import jax.numpy as jnp
from jax.experimental import pallas as pl
from jax.experimental.pallas import tpu as pltpu

HIDDEN = 256            # hidden width of the A3C trunk
LANES = 128             # lane-dense output slab width (policy logits + value live here)
SUBLANES = 8
_SMALL_BATCH_TILE = 128  # below this, run as one gridless-equivalent step
_VPU_L1_MAX_BB = 64      # VPU broadcast-FMA layer-1 only for tiny batch tiles


def _round_up(a, m):
    return -(-a // m) * m


def a3c_kernel(x_ref, w1b1_ref, wh_ref, out_ref, *, in_features, hidden, use_mxu_l1):
    """Fused forward: out = relu(x @ W1 + b1) @ [Wp|Wv|0] + [bp|bv|0]."""
    x = x_ref[...].astype(jnp.float32)                     # mirrors x.float()
    bias1 = w1b1_ref[in_features:in_features + 1, :]       # (1, hidden)

    if use_mxu_l1:
        # Large batch tile (or large K): one MXU pass. The wrapper zero-padded the
        # feature dim to a sublane multiple, and any extra w1b1 rows inside [0:kf)
        # (the b1 row / zero padding) are multiplied by zero columns of x.
        kf = x.shape[1]
        acc = jnp.dot(x, w1b1_ref[0:kf, :], preferred_element_type=jnp.float32)
    else:
        # Tiny batch tile with degenerate K (CartPole: K=4): unrolled VPU
        # broadcast-FMAs, skipping an MXU pass entirely.
        acc = x[:, 0:1] * w1b1_ref[0:1, :]
        for k in range(1, in_features):                    # static unroll
            acc = acc + x[:, k:k + 1] * w1b1_ref[k:k + 1, :]
    base = jnp.maximum(acc + bias1, 0.0)                   # (bb, hidden)

    # Fused heads: one lane-dense MXU matmul, bias folded in as slab row `hidden`.
    heads = jnp.dot(base, wh_ref[0:hidden, :],
                    preferred_element_type=jnp.float32)    # (bb, LANES)
    out_ref[...] = heads + wh_ref[hidden:hidden + 1, :]


def pack_params(params):
    """Pack the 6 PyTorch-layout params into 2 lane/tile-friendly weight slabs."""
    w1, b1 = params["w1"], params["b1"]
    wp, bp = params["wp"], params["bp"]
    wv, bv = params["wv"], params["bv"]
    in_features, hidden = w1.shape
    n_actions = wp.shape[1]
    # TODO(synk): widen the output slab if n_actions + 1 ever exceeds 128 lanes.
    assert n_actions + 1 <= LANES

    # Slab 1: rows [0:K] = W1, row K = b1, zero-padded to a sublane multiple.
    k_pad = _round_up(in_features + 1, SUBLANES)
    w1b1 = jnp.zeros((k_pad, hidden), jnp.float32)
    w1b1 = w1b1.at[:in_features, :].set(w1.astype(jnp.float32))
    w1b1 = w1b1.at[in_features, :].set(b1.reshape(-1).astype(jnp.float32))

    # Slab 2: lanes [0:n_actions] = policy head, lane n_actions = value head.
    #         rows [0:hidden] = weights, row hidden = biases; zero padding elsewhere.
    h_pad = _round_up(hidden + 1, SUBLANES)
    wh = jnp.zeros((h_pad, LANES), jnp.float32)
    wh = wh.at[:hidden, :n_actions].set(wp.astype(jnp.float32))
    wh = wh.at[:hidden, n_actions:n_actions + 1].set(wv.astype(jnp.float32))
    wh = wh.at[hidden, :n_actions].set(bp.reshape(-1).astype(jnp.float32))
    wh = wh.at[hidden, n_actions].set(bv.reshape(()).astype(jnp.float32))
    return w1b1, wh


def _choose_block_b(B, block_b):
    """Batch tile: whole batch for small B; big tiles with >=2 grid steps for large B."""
    B8 = _round_up(B, SUBLANES)
    if B8 <= _SMALL_BATCH_TILE:
        return B8                              # single gridless-equivalent step
    # Keep >= 2 grid steps so the "parallel" axis feeds both v7x TensorCores.
    half = _round_up(-(-B8 // 2), SUBLANES)
    return max(SUBLANES, min(block_b, half))


def a3c_forward(x, packed, n_actions, *, block_b=512, return_raw_slab=False):
    """Fused A3CNet forward. Returns (policy_logits (B, n_actions), value (B, 1))."""
    w1b1, wh = packed
    B, in_features = x.shape
    hidden = w1b1.shape[1]

    bb = _choose_block_b(B, block_b)
    B_pad = _round_up(B, bb)
    use_mxu_l1 = not (in_features <= 16 and bb <= _VPU_L1_MAX_BB)
    feat = _round_up(in_features, SUBLANES) if use_mxu_l1 else in_features

    pad_b, pad_f = B_pad - B, feat - in_features
    if pad_b or pad_f:
        # TODO(synk): for the hot small-B RL step, keep x pre-padded upstream so this
        # pad (and the out[:B] slice below) never materialize as extra XLA ops.
        x = jnp.pad(x, ((0, pad_b), (0, pad_f)))
    grid = (B_pad // bb,)

    kernel = functools.partial(a3c_kernel, in_features=in_features,
                               hidden=hidden, use_mxu_l1=use_mxu_l1)

    # Cheap insurance for very large tiles: explicit scoped-VMEM cap and a cost hint
    # for XLA's scheduler around the custom call.
    vmem_need = (2 * (bb * feat * 4)            # double-buffered x tiles
                 + 2 * (bb * LANES * 4)         # double-buffered output tiles
                 + 2 * (w1b1.nbytes + wh.nbytes))
    vmem_limit = int(min(max(2 * vmem_need, 16 * 1024 * 1024), 64 * 1024 * 1024))
    cost = pl.CostEstimate(
        flops=2 * B_pad * (in_features * hidden + hidden * LANES),
        transcendentals=0,
        bytes_accessed=int(B_pad * feat * 4 + w1b1.nbytes + wh.nbytes
                           + B_pad * LANES * 4),
    )

    out = pl.pallas_call(
        kernel,
        out_shape=jax.ShapeDtypeStruct((B_pad, LANES), jnp.float32),
        grid_spec=pltpu.PrefetchScalarGridSpec(
            num_scalar_prefetch=0,
            grid=grid,
            in_specs=[
                pl.BlockSpec((bb, feat), lambda i: (i, 0)),          # batch tile of x
                pl.BlockSpec(w1b1.shape, lambda i: (0, 0)),          # resident weight slab
                pl.BlockSpec(wh.shape, lambda i: (0, 0)),            # resident head slab
            ],
            out_specs=pl.BlockSpec((bb, LANES), lambda i: (i, 0)),   # lane-dense output slab
        ),
        compiler_params=pltpu.CompilerParams(
            dimension_semantics=("parallel",),
            vmem_limit_bytes=vmem_limit,
        ),
        cost_estimate=cost,
    )(x, w1b1, wh)

    if return_raw_slab:
        # NOTE: rows >= B of the slab hold relu(b1)@Wh + bias junk from batch padding;
        # a fused downstream consumer (softmax/loss) must mask them.
        return out
    out = out[:B]
    return out[:, :n_actions], out[:, n_actions:n_actions + 1]


def init_params(key, in_features, hidden, n_actions):
    """Deterministic init mimicking nn.Linear's U(-1/sqrt(fan_in), 1/sqrt(fan_in))."""
    ks = jax.random.split(key, 6)

    def lin(kw, kb, fan_in, fan_out):
        bound = 1.0 / jnp.sqrt(jnp.float32(fan_in))
        w = jax.random.uniform(kw, (fan_in, fan_out), jnp.float32, -bound, bound)
        b = jax.random.uniform(kb, (1, fan_out), jnp.float32, -bound, bound)
        return w, b

    w1, b1 = lin(ks[0], ks[1], in_features, hidden)
    wp, bp = lin(ks[2], ks[3], hidden, n_actions)
    wv, bv = lin(ks[4], ks[5], hidden, 1)
    return {"w1": w1, "b1": b1, "wp": wp, "bp": bp, "wv": wv, "bv": bv}


def reference_forward(x, params):
    base = jnp.maximum(x.astype(jnp.float32) @ params["w1"] + params["b1"], 0.0)
    return base @ params["wp"] + params["bp"], base @ params["wv"] + params["bv"]


if __name__ == "__main__":
    # CartPole-ish shapes: observation dim 4, 2 actions.
    B, IN_FEATURES, HIDDEN_DIM, N_ACTIONS = 8, 4, 256, 2

    key = jax.random.PRNGKey(0)
    k_x, k_p = jax.random.split(key)
    x = jax.random.normal(k_x, (B, IN_FEATURES), jnp.float32)
    params = init_params(k_p, IN_FEATURES, HIDDEN_DIM, N_ACTIONS)
    packed = pack_params(params)

    # Small-batch RL step: single grid step, VPU layer-1 path.
    policy, value = a3c_forward(x, packed, N_ACTIONS)
    jax.block_until_ready((policy, value))
    ref_policy, ref_value = reference_forward(x, params)
    assert policy.shape == (B, N_ACTIONS) and value.shape == (B, 1)
    assert jnp.allclose(policy, ref_policy, atol=1e-5, rtol=1e-5)
    assert jnp.allclose(value, ref_value, atol=1e-5, rtol=1e-5)

    # Ragged small batch: exercises the batch-padding path.
    x2 = jax.random.normal(jax.random.PRNGKey(1), (6, IN_FEATURES), jnp.float32)
    p2, v2 = a3c_forward(x2, packed, N_ACTIONS)
    jax.block_until_ready((p2, v2))
    rp2, rv2 = reference_forward(x2, params)
    assert p2.shape == (6, N_ACTIONS) and v2.shape == (6, 1)
    assert jnp.allclose(p2, rp2, atol=1e-5, rtol=1e-5)
    assert jnp.allclose(v2, rv2, atol=1e-5, rtol=1e-5)

    # Large batch: bb=512 tiles, >=2 grid steps ("parallel" axis for v7x megacore),
    # MXU layer-1 path with sublane-padded K, batch+feature padding exercised.
    BL = 1200
    x3 = jax.random.normal(jax.random.PRNGKey(2), (BL, IN_FEATURES), jnp.float32)
    p3, v3 = a3c_forward(x3, packed, N_ACTIONS)
    jax.block_until_ready((p3, v3))
    rp3, rv3 = reference_forward(x3, params)
    assert p3.shape == (BL, N_ACTIONS) and v3.shape == (BL, 1)
    assert jnp.allclose(p3, rp3, atol=1e-4, rtol=1e-4)
    assert jnp.allclose(v3, rv3, atol=1e-4, rtol=1e-4)

    print("KERNEL_OK")
</pallas_src>

<mosaic_0001>
module attributes {stable_mosaic.version = 11 : i64} {
  func.func @a3c_kernel(%arg0: i32, %arg1: memref<8x4xf32, #tpu.memory_space<vmem>>, %arg2: memref<8x256xf32, #tpu.memory_space<vmem>>, %arg3: memref<264x128xf32, #tpu.memory_space<vmem>>, %arg4: memref<8x128xf32, #tpu.memory_space<vmem>>) attributes {dimension_semantics = [#tpu.dimension_semantics<parallel>], iteration_bounds = array<i64: 1>, scalar_prefetch = 0 : i64, scratch_operands = 0 : i64, tpu.core_type = #tpu.core_type<tc>, window_params = [{transform_indices = @transform_0, window_bounds = array<i64: 8, 4>}, {pipeline_mode = #tpu.pipeline_mode<synchronous>, transform_indices = @transform_1, window_bounds = array<i64: 8, 256>}, {pipeline_mode = #tpu.pipeline_mode<synchronous>, transform_indices = @transform_2, window_bounds = array<i64: 264, 128>}, {transform_indices = @transform_3, window_bounds = array<i64: 8, 128>}]} {
    %c0 = arith.constant 0 : index
    %c0_0 = arith.constant 0 : index
    %0 = vector.load %arg1[%c0, %c0_0] : memref<8x4xf32, #tpu.memory_space<vmem>>, vector<8x4xf32>
    %c4 = arith.constant 4 : index
    %c0_1 = arith.constant 0 : index
    %1 = vector.load %arg2[%c4, %c0_1] : memref<8x256xf32, #tpu.memory_space<vmem>>, vector<1x256xf32>
    %2 = vector.extract_strided_slice %0 {offsets = [0, 0], sizes = [8, 1], strides = [1, 1]} : vector<8x4xf32> to vector<8x1xf32>
    %c0_2 = arith.constant 0 : index
    %c0_3 = arith.constant 0 : index
    %3 = vector.load %arg2[%c0_2, %c0_3] : memref<8x256xf32, #tpu.memory_space<vmem>>, vector<1x256xf32>
    %4 = vector.broadcast %2 : vector<8x1xf32> to vector<8x256xf32>
    %5 = vector.broadcast %3 : vector<1x256xf32> to vector<8x256xf32>
    %6 = arith.mulf %4, %5 : vector<8x256xf32>
    %7 = vector.extract_strided_slice %0 {offsets = [0, 1], sizes = [8, 1], strides = [1, 1]} : vector<8x4xf32> to vector<8x1xf32>
    %c1 = arith.constant 1 : index
    %c0_4 = arith.constant 0 : index
    %8 = vector.load %arg2[%c1, %c0_4] : memref<8x256xf32, #tpu.memory_space<vmem>>, vector<1x256xf32>
    %9 = vector.broadcast %7 : vector<8x1xf32> to vector<8x256xf32>
    %10 = vector.broadcast %8 : vector<1x256xf32> to vector<8x256xf32>
    %11 = arith.mulf %9, %10 : vector<8x256xf32>
    %12 = arith.addf %6, %11 : vector<8x256xf32>
    %13 = vector.extract_strided_slice %0 {offsets = [0, 2], sizes = [8, 1], strides = [1, 1]} : vector<8x4xf32> to vector<8x1xf32>
    %c2 = arith.constant 2 : index
    %c0_5 = arith.constant 0 : index
    %14 = vector.load %arg2[%c2, %c0_5] : memref<8x256xf32, #tpu.memory_space<vmem>>, vector<1x256xf32>
    %15 = vector.broadcast %13 : vector<8x1xf32> to vector<8x256xf32>
    %16 = vector.broadcast %14 : vector<1x256xf32> to vector<8x256xf32>
    %17 = arith.mulf %15, %16 : vector<8x256xf32>
    %18 = arith.addf %12, %17 : vector<8x256xf32>
    %19 = vector.extract_strided_slice %0 {offsets = [0, 3], sizes = [8, 1], strides = [1, 1]} : vector<8x4xf32> to vector<8x1xf32>
    %c3 = arith.constant 3 : index
    %c0_6 = arith.constant 0 : index
    %20 = vector.load %arg2[%c3, %c0_6] : memref<8x256xf32, #tpu.memory_space<vmem>>, vector<1x256xf32>
    %21 = vector.broadcast %19 : vector<8x1xf32> to vector<8x256xf32>
    %22 = vector.broadcast %20 : vector<1x256xf32> to vector<8x256xf32>
    %23 = arith.mulf %21, %22 : vector<8x256xf32>
    %24 = arith.addf %18, %23 : vector<8x256xf32>
    %25 = vector.broadcast %1 : vector<1x256xf32> to vector<8x256xf32>
    %26 = arith.addf %24, %25 : vector<8x256xf32>
    %cst = arith.constant 0.000000e+00 : f32
    %27 = vector.broadcast %cst : f32 to vector<8x256xf32>
    %28 = arith.maximumf %26, %27 : vector<8x256xf32>
    %c0_7 = arith.constant 0 : index
    %c0_8 = arith.constant 0 : index
    %29 = vector.load %arg3[%c0_7, %c0_8] : memref<264x128xf32, #tpu.memory_space<vmem>>, vector<256x128xf32>
    %cst_9 = arith.constant dense<0.000000e+00> : vector<8x128xf32>
    %30 = tpu.matmul %28, %29, %cst_9 {dimension_numbers = #tpu.dot_dimension_numbers<[1], [0], [0], [1], [0, 0, 1, 1], [], []>} : vector<8x256xf32>, vector<256x128xf32>, vector<8x128xf32> -> vector<8x128xf32>
    %c256 = arith.constant 256 : index
    %c0_10 = arith.constant 0 : index
    %31 = vector.load %arg3[%c256, %c0_10] : memref<264x128xf32, #tpu.memory_space<vmem>>, vector<1x128xf32>
    %32 = vector.broadcast %31 : vector<1x128xf32> to vector<8x128xf32>
    %33 = arith.addf %30, %32 : vector<8x128xf32>
    %c0_11 = arith.constant 0 : index
    %c0_12 = arith.constant 0 : index
    %34 = vector.load %arg4[%c0_11, %c0_12] : memref<8x128xf32, #tpu.memory_space<vmem>>, vector<8x128xf32>
    tpu.vector_store %arg4[%c0_11, %c0_12], %33 {strides = array<i32>} : memref<8x128xf32, #tpu.memory_space<vmem>>, vector<8x128xf32>,
    return
  }
  func.func @transform_0(%arg0: i32) -> (i32, i32) {
    %c0_i32 = arith.constant 0 : i32
    %c0_i32_0 = arith.constant 0 : i32
    return %arg0, %c0_i32 : i32, i32
  }
  func.func @transform_1(%arg0: i32) -> (i32, i32) {
    %c0_i32 = arith.constant 0 : i32
    %c0_i32_0 = arith.constant 0 : i32
    %c0_i32_1 = arith.constant 0 : i32
    return %c0_i32, %c0_i32_0 : i32, i32
  }
  func.func @transform_2(%arg0: i32) -> (i32, i32) {
    %c0_i32 = arith.constant 0 : i32
    %c0_i32_0 = arith.constant 0 : i32
    %c0_i32_1 = arith.constant 0 : i32
    return %c0_i32, %c0_i32_0 : i32, i32
  }
  func.func @transform_3(%arg0: i32) -> (i32, i32) {
    %c0_i32 = arith.constant 0 : i32
    %c0_i32_0 = arith.constant 0 : i32
    return %arg0, %c0_i32 : i32, i32
  }
}

</mosaic_0001>

<bundles_post_ra>
// kernel: tpu_custom_call.1
= control target key start
LH: loop header
LB: loop body
LE: loop exit
PB: predicated region body
PF: predicated region fallthrough
CT: control target
= control target key end

     0   :  { %8 = vsyncpa [#allocation3], 0  ;;  %s494_s0 = inlined_call_operand.vmem [shape: f32[8,4], index: 0, kind: input, shape index: {}]   ;;  %s495_s1 = inlined_call_operand.hbm [shape: f32[8,256], index: 1, kind: input, shape index: {}]   ;;  %s496_s2 = inlined_call_operand.hbm [shape: f32[264,128], index: 2, kind: input, shape index: {}]   ;;  %s497_s3 = inlined_call_operand.hbm [shape: f32[8,128], index: 3, kind: output, shape index: {}]  }
   0x1   :  { %9 = vsyncpa [#allocation6], 0 }
   0x2   :  { %10 = vsyncpa [#allocation4], 0  ;;  %s419_s12 = smov [#allocation2]   ;;  %s420_s14 = smov [#allocation5]  }
   0x3   :  { %s19_s13 = sshll.u32 %s419_s12, 4  ;;  %s28_s15 = sshll.u32 %s420_s14, 4  ;;  %s20_s13 = int_to_ptr.vmem [resolvable:$true] %s19_s13  ;;  %s448_s15 = int_to_ptr.vmem [resolvable:$true] %s28_s15 }
   0x4   :  { %s347_s18 = scalar_lea.hbm %s495_s1, 256 }
   0x5   :  { %p348_p0 = scmp.ne.s32.totalorder %s495_s1, %s347_s18  ;;  %p351_p1 = scmp.lt.u32.totalorder %s347_s18, %s495_s1 }
   0x7   :  { %p353_p2 = pnand %p351_p1, %p348_p0 }
   0x9   :  { %356 = shalt.err (!%p353_p2)
}
   0xa   :  { %s357_s23 = scalar_lea.vmem %s20_s13, 256  ;;  %p362_p4 = scmp.lt.s32.totalorder %s20_s13, %s20_s13 }
   0xb   :  { %p358_p3 = scmp.ne.s32.totalorder %s20_s13, %s357_s23  ;;  %p363_p5 = scmp.lt.s32.totalorder %s357_s23, %s357_s23 }
   0xd   :  { %p364_p6 = por %p363_p5, %p362_p4 }
   0xf   :  { %p365_p7 = pnand %p364_p6, %p358_p3 }
  0x11   :  { %368 = shalt.err (!%p365_p7)
}
  0x12   :  { %22 = dma.hbm_to_vmem [thread:$0]  %s495_s1, 256, %s20_s13, [#allocation3]  }
  0x13   :  { %s369_s28 = scalar_lea.hbm %s496_s2, 4224 }
  0x14   :  { %p370_p8 = scmp.ne.s32.totalorder %s496_s2, %s369_s28  ;;  %p373_p9 = scmp.lt.u32.totalorder %s369_s28, %s496_s2 }
  0x16   :  { %p375_p10 = pnand %p373_p9, %p370_p8 }
  0x18   :  { %378 = shalt.err (!%p375_p10)
}
  0x19   :  { %s379_s6 = scalar_lea.vmem %s448_s15, 4224  ;;  %p384_p12 = scmp.lt.s32.totalorder %s448_s15, %s448_s15 }
  0x1a   :  { %p380_p11 = scmp.ne.s32.totalorder %s448_s15, %s379_s6  ;;  %p385_p13 = scmp.lt.s32.totalorder %s379_s6, %s379_s6 }
  0x1c   :  { %p386_p0 = por %p385_p13, %p384_p12 }
  0x1e   :  { %p387_p1 = pnand %p386_p0, %p380_p11 }
  0x20   :  { %390 = shalt.err (!%p387_p1)
}
  0x21   :  { %s421_s1 = smov 128   ;;  %s422_s7 = smov 8  }
  0x22   :  { %34 = dma.hbm_to_vmem [thread:$0]  %s496_s2, 4224, %s448_s15, [#allocation6], %s421_s1, %s421_s1, %s422_s7  }
  0x23   :  { %413 = dma.done.wait [#allocation3], 256  }
  0x24   :  { %414 = vsyncadd [#allocation3], 4294967040 }
  0x25   :  { %415 = dma.done.wait [#allocation6], 4224  }
  0x26   :  { %416 = vsyncadd [#allocation6], 4294963072  ;;  %v423_v0 = vmov 0   ;;  %v424_v1 = vmov 2   ;;  %v41_v2 = vld [vmem:[%s494_s0] sm:$0xff]  ;;  %v157_v3 = vld [vmem:[#allocation5 + $0x80] sm:$0xff]  ;;  %v51_v53 = vlaneseq }
  0x27   :  { %342 = vset.pattern.permute.xlu0 %v423_v0  ;;  %344 = vset.pattern.permute.xlu1 %v424_v1  ;;  %v158_v4 = vld [vmem:[#allocation5 + $0x88] sm:$0xff]  ;;  %v141_v6 = vld [vmem:[#allocation5] sm:$0xff]  ;;  %v159_v8 = vld [vmem:[#allocation5 + $0x90] sm:$0xff]  ;;  %v425_v17 = vmov 1   ;;  %v426_v18 = vmov 3   ;;  %s427_s0 = smov [#allocation7]  }
  0x28   :  { %47 = vperm.xlu0 %342, %v41_v2   ;;  %87 = vperm.xlu1 %344, %v41_v2   ;;  %v301_v5 = vpack.c.bf16 %v158_v4, %v157_v3  ;;  %v142_v7 = vld [vmem:[#allocation5 + $0x8] sm:$0xff]  ;;  %v160_v10 = vld [vmem:[#allocation5 + $0x98] sm:$0xff]  ;;  %v143_v11 = vld [vmem:[#allocation5 + $0x10] sm:$0xff]  ;;  %v52_v54 = vshrl.u32 %v51_v53, 7  ;;  %s255_s2 = sshll.u32 %s427_s0, 4  ;;  %s256_s2 = int_to_ptr.vmem [resolvable:$true] %s255_s2 }
  0x29   :  { %v303_v9 = vpack.c.bf16 %v142_v7, %v141_v6  ;;  %v144_v12 = vld [vmem:[#allocation5 + $0x18] sm:$0xff]  ;;  %v305_v13 = vpack.c.bf16 %v160_v10, %v159_v8  ;;  %v161_v14 = vld [vmem:[#allocation5 + $0xa0] sm:$0xff]  ;;  %v162_v15 = vld [vmem:[#allocation5 + $0xa8] sm:$0xff]  ;;  %s391_s12 = scalar_lea.vmem %s256_s2, 128  ;;  %p396_p3 = scmp.lt.s32.totalorder %s256_s2, %s256_s2 }
  0x2a   :  { %302 = vmatprep.subr.bf16.mxu0 %v301_v5  ;;  %v307_v16 = vpack.c.bf16 %v144_v12, %v143_v11  ;;  %v309_v19 = vpack.c.bf16 %v162_v15, %v161_v14  ;;  %v145_v20 = vld [vmem:[#allocation5 + $0x20] sm:$0xff]  ;;  %v146_v21 = vld [vmem:[#allocation5 + $0x28] sm:$0xff]  ;;  %v163_v22 = vld [vmem:[#allocation5 + $0xb0] sm:$0xff]  ;;  %v53_v55 = vsub.s32 0, %v52_v54  ;;  %v57_v56 = vsub.s32 1, %v52_v54  ;;  %p392_p2 = scmp.ne.s32.totalorder %s256_s2, %s391_s12  ;;  %p397_p4 = scmp.lt.s32.totalorder %s391_s12, %s391_s12 }
  0x2b   :  { %304 = vmatpush3.bf16.msra.mxu0 %v303_v9  ;;  %v164_v23 = vld [vmem:[#allocation5 + $0xb8] sm:$0xff]  ;;  %v311_v24 = vpack.c.bf16 %v146_v21, %v145_v20  ;;  %v147_v26 = vld [vmem:[#allocation5 + $0x30] sm:$0xff]  ;;  %v165_v28 = vld [vmem:[#allocation5 + $0xc0] sm:$0xff] }
  0x2c   :  { %343 = vset.pattern.permute.xlu0 %v425_v17  ;;  %345 = vset.pattern.permute.xlu1 %v426_v18  ;;  %v313_v25 = vpack.c.bf16 %v164_v23, %v163_v22  ;;  %v148_v27 = vld [vmem:[#allocation5 + $0x38] sm:$0xff]  ;;  %v166_v29 = vld [vmem:[#allocation5 + $0xc8] sm:$0xff]  ;;  %v149_v32 = vld [vmem:[#allocation5 + $0x40] sm:$0xff]  ;;  %p398_p5 = por %p397_p4, %p396_p3 }
  0x2d   :  { %66 = vperm.xlu0 %343, %v41_v2   ;;  %108 = vperm.xlu1 %345, %v41_v2   ;;  %v315_v30 = vpack.c.bf16 %v148_v27, %v147_v26  ;;  %v317_v31 = vpack.c.bf16 %v166_v29, %v165_v28  ;;  %v150_v33 = vld [vmem:[#allocation5 + $0x48] sm:$0xff]  ;;  %v167_v34 = vld [vmem:[#allocation5 + $0xd0] sm:$0xff]  ;;  %v168_v35 = vld [vmem:[#allocation5 + $0xd8] sm:$0xff] }
  0x2e   :  { %306 = vmatprep.subr.bf16.mxu0 %v305_v13  ;;  %v319_v36 = vpack.c.bf16 %v150_v33, %v149_v32  ;;  %v321_v37 = vpack.c.bf16 %v168_v35, %v167_v34  ;;  %v151_v38 = vld [vmem:[#allocation5 + $0x50] sm:$0xff]  ;;  %v152_v39 = vld [vmem:[#allocation5 + $0x58] sm:$0xff]  ;;  %v169_v40 = vld [vmem:[#allocation5 + $0xe0] sm:$0xff]  ;;  %p399_p6 = pnand %p398_p5, %p392_p2 }
  0x2f   :  { %308 = vmatpush3.bf16.msra.mxu0 %v307_v16  ;;  %v170_v41 = vld [vmem:[#allocation5 + $0xe8] sm:$0xff]  ;;  %v323_v42 = vpack.c.bf16 %v152_v39, %v151_v38  ;;  %v153_v44 = vld [vmem:[#allocation5 + $0x60] sm:$0xff]  ;;  %v171_v46 = vld [vmem:[#allocation5 + $0xf0] sm:$0xff] }
  0x30   :  { %310 = vmatprep.subr.bf16.mxu0 %v309_v19  ;;  %v325_v43 = vpack.c.bf16 %v170_v41, %v169_v40  ;;  %v154_v45 = vld [vmem:[#allocation5 + $0x68] sm:$0xff]  ;;  %v172_v47 = vld [vmem:[#allocation5 + $0xf8] sm:$0xff]  ;;  %v155_v50 = vld [vmem:[#allocation5 + $0x70] sm:$0xff] }
  0x31   :  { %346 = vset.pattern.permute.xlu0 %v426_v18  ;;  %v327_v48 = vpack.c.bf16 %v154_v45, %v153_v44  ;;  %v329_v49 = vpack.c.bf16 %v172_v47, %v171_v46  ;;  %v156_v51 = vld [vmem:[#allocation5 + $0x78] sm:$0xff] }
  0x32   :  { %v331_v52 = vpack.c.bf16 %v156_v51, %v155_v50  ;;  %v44_v57 = vld [vmem:[#allocation2] ss:$8 sm:$0x3]  ;;  %v64_v58 = vld [vmem:[#allocation2 + $0x1] ss:$8 sm:$0x3] }
  0x33   :  { %312 = vmatpush3.bf16.msra.mxu0 %v311_v24  ;;  %v85_v60 = vld [vmem:[#allocation2 + $0x2] ss:$8 sm:$0x3]  ;;  %v106_v62 = vld [vmem:[#allocation2 + $0x3] ss:$8 sm:$0x3]  ;;  %v54_v63 = vrot.slane %v44_v57, %v53_v55  ;;  %v58_v0 = vrot.slane %v44_v57, %v57_v56  ;;  %v73_v1 = vrot.slane %v64_v58, %v53_v55  ;;  %v77_v2 = vrot.slane %v64_v58, %v57_v56 }
  0x34   :  { %314 = vmatprep.subr.bf16.mxu0 %v313_v25  ;;  %v94_v3 = vrot.slane %v85_v60, %v53_v55  ;;  %v98_v4 = vrot.slane %v85_v60, %v57_v56  ;;  %v115_v5 = vrot.slane %v106_v62, %v53_v55  ;;  %v119_v6 = vrot.slane %v106_v62, %v57_v56  ;;  %v43_v15 = vld [vmem:[#allocation2 + $0x4] ss:$8 sm:$0x3] }
  0x35   :  { %v130_v22 = vrot.slane %v43_v15, %v53_v55  ;;  %v134_v23 = vrot.slane %v43_v15, %v57_v56 }
  0x37   :  { %316 = vmatpush3.bf16.msra.mxu0 %v315_v30 }
  0x38   :  { %318 = vmatprep.subr.bf16.mxu0 %v317_v31  ;;  %v265_v31 = vld [vmem:[#allocation5 + $0x100] ss:$0 sm:$0xff] }
  0x3b   :  { %320 = vmatpush3.bf16.msra.mxu0 %v319_v36 }
  0x3c   :  { %322 = vmatprep.subr.bf16.mxu0 %v321_v37 }
  0x3f   :  { %324 = vmatpush3.bf16.msra.mxu0 %v323_v42 }
  0x40   :  { %326 = vmatprep.subr.bf16.mxu0 %v325_v43 }
  0x43   :  { %328 = vmatpush3.bf16.msra.mxu0 %v327_v48 }
  0x44   :  { %330 = vmatprep.subr.bf16.mxu0 %v329_v49 }
  0x47   :  { %332 = vmatpush3.bf16.msra.mxu0 %v331_v52 }
  0xa7   :  { %v48_v59 = vpop.permute.xlu0 %47  ;;  %v88_v61 = vpop.permute.xlu1 %87 }
  0xa8   :  { %v61_v9 = vmul.f32 %v54_v63, %v48_v59  ;;  %v62_v10 = vmul.f32 %v58_v0, %v48_v59  ;;  %v101_v13 = vmul.f32 %v94_v3, %v88_v61  ;;  %v102_v14 = vmul.f32 %v98_v4, %v88_v61 }
  0xac   :  { %v67_v7 = vpop.permute.xlu0 %66  ;;  %v109_v8 = vpop.permute.xlu1 %108 }
  0xad   :  { %v80_v11 = vmul.f32 %v73_v1, %v67_v7  ;;  %v81_v12 = vmul.f32 %v77_v2, %v67_v7  ;;  %v122_v18 = vmul.f32 %v115_v5, %v109_v8  ;;  %v123_v19 = vmul.f32 %v119_v6, %v109_v8 }
  0xaf   :  { %v82_v16 = vadd.f32 %v80_v11, %v61_v9  ;;  %v83_v17 = vadd.f32 %v81_v12, %v62_v10 }
  0xb1   :  { %v103_v20 = vadd.f32 %v101_v13, %v82_v16  ;;  %v104_v21 = vadd.f32 %v102_v14, %v83_v17 }
  0xb3   :  { %v124_v24 = vadd.f32 %v122_v18, %v103_v20  ;;  %v125_v25 = vadd.f32 %v123_v19, %v104_v21 }
  0xb5   :  { %v138_v26 = vadd.f32 %v134_v23, %v125_v25  ;;  %v137_v27 = vadd.f32 %v130_v22, %v124_v24 }
  0xb7   :  { %v140_v28 = vmax.f32 %v138_v26, 0.0  ;;  %v139_v29 = vmax.f32 %v137_v27, 0.0 }
  0xb9   :  { %242 = vmatprep.mubr.f32.mxu0 %v140_v28 }
  0xba   :  { %243 = vmatmul.mubr.f32.vlgmr.msra.gmra.mrb[0].mxu0 %v139_v29 }
 0x18d   :  { %v298_v30 = vpop.f32.mrb[0].mxu0 }
 0x18e   :  { %v299_v32 = vpop.f32.mrb[1].mxu0 }
 0x18f   :  { %v300_v33 = vadd.f32 %v299_v32, %v298_v30 }
 0x191   :  { %v245_v34 = vadd.f32 %v300_v33, %v265_v31 }
 0x193   :  { %248 = vst [vmem:[#allocation7] sm:$0xff] %v245_v34 }
 0x194   :  { %402 = shalt.err (!%p399_p6)
}
 0x195   :  { %s403_s15 = scalar_lea.hbm %s497_s3, 128 }
 0x196   :  { %p404_p7 = scmp.ne.s32.totalorder %s497_s3, %s403_s15  ;;  %p407_p8 = scmp.lt.u32.totalorder %s403_s15, %s497_s3 }
 0x198   :  { %p409_p9 = pnand %p407_p8, %p404_p7 }
 0x19a   :  { %412 = shalt.err (!%p409_p9)
}
 0x19b   :  { %258 = dma.vmem_to_hbm [thread:$0]  %s256_s2, 128, %s497_s3, [#allocation4]  }
 0x19c   :  { %417 = dma.done.wait [#allocation4], 128  }
 0x19d   :  { %418 = vsyncadd [#allocation4], 4294967168 }
 0x19e   :  { %262 = vsyncpa [#allocation3], 1 }
 0x19f   :  { %263 = vsyncpa [#allocation6], 1 }
 0x1a0   :  { %264 = vsyncpa [#allocation4], 1 }

</bundles_post_ra>
